<compile_context>
chip_gen: v7x
topology: tpu7x:2x2x1
jax: 0.10.0
libtpu: 0.0.40
codegen_flags: <defaults>
</compile_context>

<pallas_src>
import functools
import math

import jax
import jax.numpy as jnp
from jax.experimental import pallas as pl
from jax.experimental.pallas import tpu as pltpu


MAX_TP = 1024  # upper bound on lanes (output tiles) per grid step


def get_transforms(F, k):
    """Standard Lavin & Gray Winograd transforms (only F(2,3) needed here)."""
    assert (F, k) == (2, 3), "only F(2x2, 3x3) implemented"
    A_t = jnp.array([[1.0, 1.0, 1.0, 0.0],
                     [0.0, 1.0, -1.0, -1.0]], jnp.float32)
    B_t = jnp.array([[1.0, 0.0, -1.0, 0.0],
                     [0.0, 1.0, 1.0, 0.0],
                     [0.0, -1.0, 1.0, 0.0],
                     [0.0, 1.0, 0.0, -1.0]], jnp.float32)
    G = jnp.array([[1.0, 0.0, 0.0],
                   [0.5, 0.5, 0.5],
                   [0.5, -0.5, 0.5],
                   [0.0, 0.0, 1.0]], jnp.float32)
    return A_t, B_t, G


def _round_up(x, m):
    return ((x + m - 1) // m) * m


def _cdiv(a, b):
    return -(-a // b)


def _winograd_kernel(d_ref, uab_ref, y_ref, acc_ref):
    """One MXU GEMM per (lane-block, C-chunk) grid step.

       d_ref  : [CC*AA, TP]     raw input tiles (row = c*16 + flat 4x4 index, col = tile)
       uab_ref: [FF*Kp, CC*AA]  host-folded (A_t⊗A_t)·diag(GwG^T)·(B_t⊗B_t) weights
       y_ref  : [FF*Kp, TP]     output tiles, row = f*Kp + k (lane-dense, full sublanes)
       acc_ref: [FF*Kp, TP]     f32 accumulator across the C-chunk (reduction) grid axis."""
    c = pl.program_id(1)

    @pl.when(c == 0)
    def _():
        acc_ref[...] = jnp.zeros_like(acc_ref)

    acc_ref[...] += jnp.dot(uab_ref[...], d_ref[...],
                            preferred_element_type=jnp.float32)

    @pl.when(c == pl.num_programs(1) - 1)
    def _():
        y_ref[...] = acc_ref[...].astype(y_ref.dtype)


def _tile_input(x_padded, F, alpha):
    """Extract overlapping alpha x alpha tiles with stride F -> [C, alpha*alpha, P]."""
    N, C, Hp, Wp = x_padded.shape
    if (Hp - alpha) % F != 0 or (Wp - alpha) % F != 0:
        # TODO(synk): reference module silently drops trailing rows/cols here.
        raise NotImplementedError(
            f"padded input ({Hp}x{Wp}) does not tile evenly with F={F}, k={alpha - F + 1}")
    tH = (Hp - alpha) // F + 1
    tW = (Wp - alpha) // F + 1
    ih = jnp.arange(tH)[:, None] * F + jnp.arange(alpha)[None, :]   # [tH, alpha]
    iw = jnp.arange(tW)[:, None] * F + jnp.arange(alpha)[None, :]   # [tW, alpha]
    t = x_padded[:, :, ih, :]                  # [N, C, tH, alpha, Wp]
    t = t[:, :, :, :, iw]                      # [N, C, tH, alpha, tW, alpha]
    t = jnp.transpose(t, (1, 3, 5, 0, 2, 4))   # [C, a, b, N, tH, tW]
    d = t.reshape(C, alpha * alpha, N * tH * tW)
    return d, tH, tW


def _vmem_limit_bytes():
    """Generation-aware VMEM budget: ~75% of per-core capacity (headroom for the
    compiler's internal scratch / pipelining bookkeeping)."""
    try:
        cap = int(pltpu.get_tpu_info().vmem_capacity_bytes)
    except Exception:
        cap = 0
    if cap <= 0:
        cap = 64 * 2**20   # conservative fallback: v7x per-TensorCore VMEM
    return (cap * 3) // 4


def _choose_tiles(P, Cp, Kp, AA, FF, d_esize, out_esize, vmem_limit, c_chunk):
    """Pick the lane block TP and channel chunk CC so double-buffered blocks fit VMEM."""
    Pp128 = _round_up(max(P, 1), 128)
    n_lane = max(1, _cdiv(Pp128, MAX_TP))
    if Pp128 >= 256:
        n_lane = max(2, n_lane)   # >=2 grid steps: v7x megacore + DMA/compute overlap
    TP = _round_up(_cdiv(Pp128, n_lane), 128)

    def fits(tp, cc):
        d_blk = cc * AA * tp * d_esize
        uab_blk = FF * Kp * cc * AA * d_esize
        out_blk = FF * Kp * tp * out_esize
        acc_blk = FF * Kp * tp * 4
        # inputs/outputs double-buffered by the pipeline; accumulator is single.
        return 2 * (d_blk + uab_blk + out_blk) + acc_blk + (2 << 20) <= vmem_limit

    CC = Cp if c_chunk is None else max(8, min(Cp, _round_up(c_chunk, 8)))
    # Prefer shrinking TP to 256 first (keeps the full contraction resident, so the
    # grid-invariant UAB block is never re-fetched), then chunk C, then TP -> 128.
    while not fits(TP, CC) and TP > 256:
        TP = max(256, ((TP // 2) // 128) * 128)
    while not fits(TP, CC) and CC > 8:
        CC = _round_up(_cdiv(CC, 2), 8)
    while not fits(TP, CC) and TP > 128:
        TP = 128
    return TP, CC


@functools.partial(jax.jit, static_argnames=("F", "compute_dtype", "c_chunk"))
def conv2d_winograd(x, weight, F=2, compute_dtype=jnp.float32, c_chunk=None):
    N, C, H, W = x.shape
    K, C2, k, _ = weight.shape
    assert C2 == C
    pad = (k - 1) // 2
    alpha = F + k - 1
    AA, FF = alpha * alpha, F * F
    A_t, B_t, G = get_transforms(F, k)
    hp = jax.lax.Precision.HIGHEST          # host-side weight prep stays exact f32

    # ---- host glue: filter padding + tiling padding (mirrors Pad / pad_for_tiling) ----
    xp = jnp.pad(x, ((0, 0), (0, 0), (pad, pad), (pad, pad)))
    ntp = (xp.shape[3] - 2 * pad) / F       # width-based, exactly as the reference module
    if float(ntp).is_integer():
        tp = 0
    else:
        decimal = ntp - int(ntp)
        to_pad = round((1.0 - decimal) * F)
        tp = round(to_pad / 2)
        if tp > 0:
            xp = jnp.pad(xp, ((0, 0), (0, 0), (tp, tp), (tp, tp)))

    # ---- tile (Tiler.tile): overlapping alpha x alpha patches, stride F ----
    d, tH, tW = _tile_input(xp, F, alpha)   # [C, AA, P]
    P = N * tH * tW

    # ---- padding / tile sizing ----
    d_esize = jnp.dtype(compute_dtype).itemsize
    out_esize = jnp.dtype(x.dtype).itemsize
    pack = max(4 // d_esize, 4 // out_esize, 1)
    Kp = _round_up(K, 2 * pack)             # FF*Kp = full sublanes for all dtypes in play
    Cp = _round_up(C, 8)                    # NOTE: bump to 16 on v6e/v7x once MXU-bound
    vmem_limit = _vmem_limit_bytes()
    TP, CC = _choose_tiles(P, Cp, Kp, AA, FF, d_esize, out_esize, vmem_limit, c_chunk)
    Cpp = _round_up(Cp, CC)
    Pp = _round_up(P, TP)
    n_lane, n_red = Pp // TP, Cpp // CC

    d = jnp.pad(d, ((0, Cpp - C), (0, 0), (0, Pp - P)))
    d = d.reshape(Cpp * AA, Pp).astype(compute_dtype)     # lane-dense streamed operand

    # ---- host weight prep: fold G, B_t and A_t into ONE matrix (exact, linear) ----
    #   Y[(f,k),t] = sum_{c,b} UAB[(f,k),(c,b)] * d[(c,b),t]
    #   UAB[f,k,c,b] = sum_a (A_t⊗A_t)[f,a] * (G w_kc G^T)[a] * (B_t⊗B_t)[a,b]
    TA = jnp.kron(A_t, A_t)                 # [FF, AA]
    TB = jnp.kron(B_t, B_t)                 # [AA, AA]
    GG = jnp.kron(G, G)                     # [AA, k*k]
    U = jnp.einsum("aq,kcq->akc", GG, weight.reshape(K, C, k * k), precision=hp)
    UAB = jnp.einsum("fa,akc,ab->fkcb", TA, U, TB, precision=hp)    # [FF, K, C, AA]
    UAB = jnp.pad(UAB, ((0, 0), (0, Kp - K), (0, Cpp - C), (0, 0)))
    UAB = UAB.reshape(FF * Kp, Cpp * AA).astype(compute_dtype)

    cost = pl.CostEstimate(
        flops=2 * FF * Kp * Cpp * AA * Pp,
        transcendentals=0,
        bytes_accessed=(d.size * d_esize
                        + UAB.size * d_esize * (n_lane if n_red > 1 else 1)
                        + FF * Kp * Pp * out_esize))

    out = pl.pallas_call(
        _winograd_kernel,
        out_shape=jax.ShapeDtypeStruct((FF * Kp, Pp), x.dtype),
        grid=(n_lane, n_red),
        in_specs=[
            pl.BlockSpec((CC * AA, TP), lambda i, c: (c, i)),       # streamed input tiles
            pl.BlockSpec((FF * Kp, CC * AA), lambda i, c: (0, c)),  # folded weights
        ],
        out_specs=pl.BlockSpec((FF * Kp, TP), lambda i, c: (0, i)),
        scratch_shapes=[pltpu.VMEM((FF * Kp, TP), jnp.float32)],
        compiler_params=pltpu.CompilerParams(
            dimension_semantics=("parallel", "arbitrary"),
            vmem_limit_bytes=int(vmem_limit)),
        cost_estimate=cost,
    )(d, UAB)

    # ---- untile (Tiler.untile) + crop tiling padding ----
    y = out.reshape(FF, Kp, Pp)[:, :K, :P]                 # drop K / tile padding
    y = y.reshape(F, F, K, N, tH, tW)
    y = jnp.transpose(y, (3, 2, 4, 0, 5, 1)).reshape(N, K, tH * F, tW * F)
    if tp > 0:
        y = y[:, :, tp:-tp, tp:-tp]
    return y


# ----------------------------- validation harness ------------------------------------
def _reference_conv(x, w):
    return jax.lax.conv_general_dilated(
        x, w, window_strides=(1, 1), padding="SAME",
        dimension_numbers=("NCHW", "OIHW", "NCHW"),
        precision=jax.lax.Precision.HIGHEST)


def _check(name, out, ref, rtol, atol):
    max_err = float(jnp.max(jnp.abs(out - ref)))
    if out.shape != ref.shape or not bool(jnp.allclose(out, ref, rtol=rtol, atol=atol)):
        raise AssertionError(f"{name}: mismatch vs direct conv "
                             f"(shape {out.shape} vs {ref.shape}, max abs err = {max_err})")


def _make_case(key, N, Cin, Cout, H, W, k=3):
    kx, kw = jax.random.split(key)
    x = jax.random.normal(kx, (N, Cin, H, W), dtype=jnp.float32)
    fan_in, fan_out = Cin * k * k, Cout * k * k           # xavier_uniform_ semantics
    bound = math.sqrt(6.0 / (fan_in + fan_out))
    w = jax.random.uniform(kw, (Cout, Cin, k, k), jnp.float32, -bound, bound)
    return x, w


if __name__ == "__main__":
    k1, k2 = jax.random.split(jax.random.PRNGKey(0))

    # Tolerance note: structural / indexing bugs show up as O(1) errors; 2e-2 also covers
    # the case where default-precision f32 MXU dots are lowered as bf16 passes.
    # 1) base case (single lane block, single C chunk), f32 streaming.
    x, w = _make_case(k1, 2, 4, 8, 16, 16)
    out = jax.block_until_ready(conv2d_winograd(x, w, F=2))
    _check("f32/base", out, _reference_conv(x, w), rtol=2e-2, atol=2e-2)

    # 2) odd K (K-padding), tile-count padding, 2 lane blocks, 3-chunk C reduction.
    x2, w2 = _make_case(k2, 2, 24, 13, 20, 20)
    out2 = jax.block_until_ready(conv2d_winograd(x2, w2, F=2, c_chunk=8))
    _check("f32/multi-block", out2, _reference_conv(x2, w2), rtol=2e-2, atol=2e-2)

    # 3) bf16-streamed operands (halves HBM traffic; f32 MXU accumulation).
    out3 = jax.block_until_ready(conv2d_winograd(x, w, F=2, compute_dtype=jnp.bfloat16))
    _check("bf16/base", out3, _reference_conv(x, w), rtol=5e-2, atol=1e-1)

    print("KERNEL_OK")
</pallas_src>

<mosaic_0001>
module attributes {stable_mosaic.version = 11 : i64} {
  func.func @_winograd_kernel(%arg0: i32, %arg1: i32, %arg2: memref<128x128xf32, #tpu.memory_space<vmem>>, %arg3: memref<32x128xf32, #tpu.memory_space<vmem>>, %arg4: memref<32x128xf32, #tpu.memory_space<vmem>>, %arg5: memref<32x128xf32, #tpu.memory_space<vmem>>) attributes {dimension_semantics = [#tpu.dimension_semantics<parallel>, #tpu.dimension_semantics<arbitrary>], iteration_bounds = array<i64: 1, 1>, scalar_prefetch = 0 : i64, scratch_operands = 1 : i64, tpu.core_type = #tpu.core_type<tc>, window_params = [{transform_indices = @transform_0, window_bounds = array<i64: 128, 128>}, {transform_indices = @transform_1, window_bounds = array<i64: 32, 128>}, {transform_indices = @transform_2, window_bounds = array<i64: 32, 128>}]} {
    %c0_i32 = arith.constant 0 : i32
    %0 = arith.cmpi eq, %arg1, %c0_i32 : i32
    %1 = arith.extui %0 : i1 to i32
    %c0_i32_0 = arith.constant 0 : i32
    %2 = arith.cmpi ne, %1, %c0_i32_0 : i32
    scf.if %2 {
      %cst_10 = arith.constant 0.000000e+00 : f32
      %12 = vector.broadcast %cst_10 : f32 to vector<32x128xf32>
      %c0_11 = arith.constant 0 : index
      %c0_12 = arith.constant 0 : index
      %13 = vector.load %arg5[%c0_11, %c0_12] : memref<32x128xf32, #tpu.memory_space<vmem>>, vector<32x128xf32>
      tpu.vector_store %arg5[%c0_11, %c0_12], %12 {strides = array<i32>} : memref<32x128xf32, #tpu.memory_space<vmem>>, vector<32x128xf32>,
    } else {
    }
    %c0 = arith.constant 0 : index
    %c0_1 = arith.constant 0 : index
    %3 = vector.load %arg5[%c0, %c0_1] : memref<32x128xf32, #tpu.memory_space<vmem>>, vector<32x128xf32>
    %c0_2 = arith.constant 0 : index
    %c0_3 = arith.constant 0 : index
    %4 = vector.load %arg3[%c0_2, %c0_3] : memref<32x128xf32, #tpu.memory_space<vmem>>, vector<32x128xf32>
    %c0_4 = arith.constant 0 : index
    %c0_5 = arith.constant 0 : index
    %5 = vector.load %arg2[%c0_4, %c0_5] : memref<128x128xf32, #tpu.memory_space<vmem>>, vector<128x128xf32>
    %cst = arith.constant dense<0.000000e+00> : vector<32x128xf32>
    %6 = tpu.matmul %4, %5, %cst {dimension_numbers = #tpu.dot_dimension_numbers<[1], [0], [0], [1], [0, 0, 1, 1], [], []>} : vector<32x128xf32>, vector<128x128xf32>, vector<32x128xf32> -> vector<32x128xf32>
    %7 = arith.addf %3, %6 : vector<32x128xf32>
    %c0_6 = arith.constant 0 : index
    %c0_7 = arith.constant 0 : index
    %8 = vector.load %arg5[%c0_6, %c0_7] : memref<32x128xf32, #tpu.memory_space<vmem>>, vector<32x128xf32>
    tpu.vector_store %arg5[%c0_6, %c0_7], %7 {strides = array<i32>} : memref<32x128xf32, #tpu.memory_space<vmem>>, vector<32x128xf32>,
    %c0_i32_8 = arith.constant 0 : i32
    %9 = arith.cmpi eq, %arg1, %c0_i32_8 : i32
    %10 = arith.extui %9 : i1 to i32
    %c0_i32_9 = arith.constant 0 : i32
    %11 = arith.cmpi ne, %10, %c0_i32_9 : i32
    scf.if %11 {
      %c0_10 = arith.constant 0 : index
      %c0_11 = arith.constant 0 : index
      %12 = vector.load %arg5[%c0_10, %c0_11] : memref<32x128xf32, #tpu.memory_space<vmem>>, vector<32x128xf32>
      %c0_12 = arith.constant 0 : index
      %c0_13 = arith.constant 0 : index
      %13 = vector.load %arg4[%c0_12, %c0_13] : memref<32x128xf32, #tpu.memory_space<vmem>>, vector<32x128xf32>
      tpu.vector_store %arg4[%c0_12, %c0_13], %12 {strides = array<i32>} : memref<32x128xf32, #tpu.memory_space<vmem>>, vector<32x128xf32>,
    } else {
    }
    return
  }
  func.func @transform_0(%arg0: i32, %arg1: i32) -> (i32, i32) {
    %c0_i32 = arith.constant 0 : i32
    return %arg1, %arg0 : i32, i32
  }
  func.func @transform_1(%arg0: i32, %arg1: i32) -> (i32, i32) {
    %c0_i32 = arith.constant 0 : i32
    %c0_i32_0 = arith.constant 0 : i32
    return %c0_i32, %arg1 : i32, i32
  }
  func.func @transform_2(%arg0: i32, %arg1: i32) -> (i32, i32) {
    %c0_i32 = arith.constant 0 : i32
    %c0_i32_0 = arith.constant 0 : i32
    return %c0_i32, %arg0 : i32, i32
  }
}

</mosaic_0001>

<bundles_post_ra>
// kernel: conv2d_winograd.1
= control target key start
LH: loop header
LB: loop body
LE: loop exit
PB: predicated region body
PF: predicated region fallthrough
CT: control target
= control target key end

     0   :  { %s344_s0 = inlined_call_operand.vmem [shape: f32[128,128], index: 0, kind: input, shape index: {}]   ;;  %s345_s1 = inlined_call_operand.vmem [shape: f32[32,128], index: 1, kind: input, shape index: {}]   ;;  %s346_s2 = inlined_call_operand.vmem [shape: f32[32,128], index: 2, kind: output, shape index: {}]  }
   0x1   :  { %v27_v0 = vld [vmem:[%s344_s0] sm:$0xff]  ;;  %v28_v1 = vld [vmem:[%s344_s0 + $0x8] sm:$0xff]  ;;  %v29_v2 = vld [vmem:[%s344_s0 + $0x10] sm:$0xff] }
   0x2   :  { %v209_v3 = vpack.c.bf16 %v28_v1, %v27_v0  ;;  %v30_v4 = vld [vmem:[%s344_s0 + $0x18] sm:$0xff]  ;;  %v31_v6 = vld [vmem:[%s344_s0 + $0x20] sm:$0xff]  ;;  %v32_v7 = vld [vmem:[%s344_s0 + $0x28] sm:$0xff] }
   0x3   :  { %v213_v5 = vpack.c.bf16 %v30_v4, %v29_v2  ;;  %v217_v8 = vpack.c.bf16 %v32_v7, %v31_v6  ;;  %v23_v9 = vld [vmem:[%s345_s1] sm:$0xff]  ;;  %v25_v10 = vld [vmem:[%s345_s1 + $0x10] sm:$0xff]  ;;  %v34_v12 = vld [vmem:[%s344_s0 + $0x38] sm:$0xff] }
   0x4   :  { %210 = vmatprep.subr.bf16.mxu0 %v209_v3  ;;  %241 = vmatprep.subr.bf16.mxu1 %v209_v3  ;;  %v33_v11 = vld [vmem:[%s344_s0 + $0x30] sm:$0xff]  ;;  %v35_v14 = vld [vmem:[%s344_s0 + $0x40] sm:$0xff]  ;;  %v36_v15 = vld [vmem:[%s344_s0 + $0x48] sm:$0xff] }
   0x5   :  { %212 = vmatpush3.bf16.msra.mxu0 %v209_v3  ;;  %249 = vmatpush3.bf16.msra.mxu1 %v209_v3  ;;  %v221_v13 = vpack.c.bf16 %v34_v12, %v33_v11  ;;  %v225_v16 = vpack.c.bf16 %v36_v15, %v35_v14  ;;  %v37_v17 = vld [vmem:[%s344_s0 + $0x50] sm:$0xff]  ;;  %v38_v18 = vld [vmem:[%s344_s0 + $0x58] sm:$0xff]  ;;  %v39_v20 = vld [vmem:[%s344_s0 + $0x60] sm:$0xff] }
   0x6   :  { %214 = vmatprep.subr.bf16.mxu0 %v213_v5  ;;  %242 = vmatprep.subr.bf16.mxu1 %v213_v5  ;;  %v229_v19 = vpack.c.bf16 %v38_v18, %v37_v17  ;;  %v40_v21 = vld [vmem:[%s344_s0 + $0x68] sm:$0xff]  ;;  %v41_v23 = vld [vmem:[%s344_s0 + $0x70] sm:$0xff]  ;;  %v42_v24 = vld [vmem:[%s344_s0 + $0x78] sm:$0xff] }
   0x7   :  { %203 = vmatprep.mubr.f32.mxu0 %v23_v9  ;;  %206 = vmatprep.mubr.f32.mxu1 %v25_v10  ;;  %v233_v22 = vpack.c.bf16 %v40_v21, %v39_v20  ;;  %v237_v25 = vpack.c.bf16 %v42_v24, %v41_v23  ;;  %v24_v26 = vld [vmem:[%s345_s1 + $0x8] sm:$0xff]  ;;  %v26_v27 = vld [vmem:[%s345_s1 + $0x18] sm:$0xff] }
   0x9   :  { %216 = vmatpush3.bf16.msra.mxu0 %v213_v5  ;;  %250 = vmatpush3.bf16.msra.mxu1 %v213_v5 }
   0xa   :  { %218 = vmatprep.subr.bf16.mxu0 %v217_v8  ;;  %243 = vmatprep.subr.bf16.mxu1 %v217_v8 }
   0xd   :  { %220 = vmatpush3.bf16.msra.mxu0 %v217_v8  ;;  %251 = vmatpush3.bf16.msra.mxu1 %v217_v8 }
   0xe   :  { %222 = vmatprep.subr.bf16.mxu0 %v221_v13  ;;  %244 = vmatprep.subr.bf16.mxu1 %v221_v13 }
  0x11   :  { %224 = vmatpush3.bf16.msra.mxu0 %v221_v13  ;;  %252 = vmatpush3.bf16.msra.mxu1 %v221_v13 }
  0x12   :  { %226 = vmatprep.subr.bf16.mxu0 %v225_v16  ;;  %245 = vmatprep.subr.bf16.mxu1 %v225_v16 }
  0x15   :  { %228 = vmatpush3.bf16.msra.mxu0 %v225_v16  ;;  %253 = vmatpush3.bf16.msra.mxu1 %v225_v16 }
  0x16   :  { %230 = vmatprep.subr.bf16.mxu0 %v229_v19  ;;  %246 = vmatprep.subr.bf16.mxu1 %v229_v19 }
  0x19   :  { %232 = vmatpush3.bf16.msra.mxu0 %v229_v19  ;;  %254 = vmatpush3.bf16.msra.mxu1 %v229_v19 }
  0x1a   :  { %234 = vmatprep.subr.bf16.mxu0 %v233_v22  ;;  %247 = vmatprep.subr.bf16.mxu1 %v233_v22 }
  0x1d   :  { %236 = vmatpush3.bf16.msra.mxu0 %v233_v22  ;;  %255 = vmatpush3.bf16.msra.mxu1 %v233_v22 }
  0x1e   :  { %238 = vmatprep.subr.bf16.mxu0 %v237_v25  ;;  %248 = vmatprep.subr.bf16.mxu1 %v237_v25 }
  0x21   :  { %240 = vmatpush3.bf16.msra.mxu0 %v237_v25  ;;  %256 = vmatpush3.bf16.msra.mxu1 %v237_v25 }
  0x24   :  { %204 = vmatmul.mubr.f32.vlgmr.msra.gmra.mrb[0].mxu0 %v24_v26  ;;  %207 = vmatmul.mubr.f32.vlgmr.msra.gmra.mrb[0].mxu1 %v26_v27 }
  0xf7   :  { %v205_v28 = vpop.f32.mrb[0].mxu0  ;;  %v208_v29 = vpop.f32.mrb[0].mxu1 }
  0xf8   :  { %144 = vst [vmem:[%s346_s2 + $0x8] sm:$0xff] %v205_v28  ;;  %146 = vst [vmem:[%s346_s2 + $0x18] sm:$0xff] %v208_v29  ;;  %v109_v30 = vpop.f32.mrb[1].mxu0  ;;  %v119_v31 = vpop.f32.mrb[1].mxu1 }
  0xf9   :  { %143 = vst [vmem:[%s346_s2] sm:$0xff] %v109_v30  ;;  %145 = vst [vmem:[%s346_s2 + $0x10] sm:$0xff] %v119_v31 }

</bundles_post_ra>
